<compile_context>
chip_gen: v7x
topology: tpu7x:2x2x1
jax: 0.10.0
libtpu: 0.0.40
codegen_flags: <defaults>
</compile_context>

<pallas_src>
import numpy as np
import jax
import jax.numpy as jnp
from jax import lax
from jax.experimental import pallas as pl
from jax.experimental.pallas import tpu as pltpu

EPS = 1e-5  # PyTorch BatchNorm2d default eps


def make_kernel(H, W):
    """Kernel operating on (B*C, H*W) f32 tiles (lane-dense spatial axis)."""
    HW = H * W
    # Tap order t = ky*3 + kx with (dy, dx) = (ky-1, kx-1); matches weight/mask prep.
    offsets = tuple(dy * W + dx for dy in (-1, 0, 1) for dx in (-1, 0, 1))

    def conv3x3(h, w_big, tap_masks):
        # h: (B*C, HW); w_big: (B*C, 9*B*C); tap_masks: (9*B*C, HW)
        # shifted_t[p] = h[p + off_t]  (wraparound killed by tap_masks)
        chunks = [h if off == 0 else pltpu.roll(h, (-off) % HW, axis=1)
                  for off in offsets]
        stacked = jnp.concatenate(chunks, axis=0) * tap_masks        # (9*B*C, HW)
        return jnp.dot(w_big, stacked,
                       preferred_element_type=jnp.float32,
                       precision=lax.Precision.HIGHEST)              # (B*C, HW)

    def kernel(x_ref, aff_ref, mask_ref, w1_ref, w2_ref, o_ref):
        x = x_ref[...]                          # (B*C, HW) f32
        aff = aff_ref[...]                      # (B*C, 4): [bn_scale, bn_shift, b1, b2]
        tap_masks = mask_ref[...]               # (9*B*C, HW)
        bn_scale, bn_shift = aff[:, 0:1], aff[:, 1:2]
        bias1, bias2 = aff[:, 2:3], aff[:, 3:4]

        h = jnp.maximum(x * bn_scale + bn_shift, 0.0)       # BatchNorm (eval) + ReLU
        h = conv3x3(h, w1_ref[...], tap_masks) + bias1      # conv1, padding='same'
        # Dropout2d -> identity at inference.
        # TODO(synk): training-mode Dropout2d (stochastic whole-channel masking) not implemented.
        h = jnp.maximum(h, 0.0)                             # ReLU
        h = conv3x3(h, w2_ref[...], tap_masks) + bias2      # conv2, padding='same'
        o_ref[...] = (h + x).astype(o_ref.dtype)            # residual add

    return kernel


def _expand_conv_weight(w_oihw, batch):
    """OIHW (Cout,Cin,3,3) -> (B*Cout, 9*B*Cin) batch-block-diagonal matmul weight.

    Column index = t*(B*Cin) + b*Cin + ci (t = ky*3+kx), matching the kernel's
    tap-stacked activation rows; output row index = b*Cout + co.
    """
    cout, cin, kh, kw = w_oihw.shape
    taps = jnp.transpose(w_oihw, (2, 3, 0, 1)).reshape(kh * kw, cout, cin)  # (9,Cout,Cin)
    eye_b = jnp.eye(batch, dtype=w_oihw.dtype)
    big = jnp.einsum("tpq,ab->aptbq", taps, eye_b)          # (B, Cout, 9, B, Cin)
    return big.reshape(batch * cout, kh * kw * batch * cin).astype(jnp.float32)


def _build_tap_masks(bc, H, W):
    """(9*B*C, H*W) f32 validity masks implementing zero-padded 'same' boundaries."""
    hw = H * W
    yy = np.arange(hw) // W
    xx = np.arange(hw) % W
    rows = []
    for dy in (-1, 0, 1):
        for dx in (-1, 0, 1):
            valid = ((yy + dy >= 0) & (yy + dy < H) &
                     (xx + dx >= 0) & (xx + dx < W)).astype(np.float32)
            rows.append(np.broadcast_to(valid, (bc, hw)))
    return jnp.asarray(np.concatenate(rows, axis=0))


def prepare_params(params, B, H, W):
    """One-time prep (hoisted out of the per-call path): fold BN, reshape weights."""
    C = params["gamma"].shape[0]
    scale = params["gamma"] / jnp.sqrt(params["rvar"] + EPS)
    shift = params["beta"] - params["rmean"] * scale
    aff_c = jnp.stack([scale, shift, params["b1"], params["b2"]], axis=1)   # (C,4)
    aff = jnp.tile(aff_c, (B, 1)).astype(jnp.float32)                       # (B*C,4)
    w1b = _expand_conv_weight(params["w1"], B)
    w2b = _expand_conv_weight(params["w2"], B)
    masks = _build_tap_masks(B * C, H, W)
    return aff, w1b, w2b, masks


@jax.jit
def residual_with_dropout(x_nchw, prepared):
    """x_nchw: (B, C, H, W) float32 (PyTorch layout). Returns (B, C, H, W)."""
    aff, w1b, w2b, masks = prepared
    B, C, H, W = x_nchw.shape
    BC, HW = B * C, H * W
    K = 9 * BC
    x2d = x_nchw.reshape(BC, HW)                 # contiguous reshape: no transpose cost

    out2d = pl.pallas_call(
        make_kernel(H, W),
        out_shape=jax.ShapeDtypeStruct((BC, HW), jnp.float32),
        grid=(1,),                               # whole batch in one VMEM-resident step
        in_specs=[
            pl.BlockSpec((BC, HW), lambda i: (0, 0)),   # x (channel-major, lane-dense)
            pl.BlockSpec((BC, 4), lambda i: (0, 0)),    # [bn_scale, bn_shift, b1, b2]
            pl.BlockSpec((K, HW), lambda i: (0, 0)),    # 3x3 tap boundary masks
            pl.BlockSpec((BC, K), lambda i: (0, 0)),    # conv1 matmul weight
            pl.BlockSpec((BC, K), lambda i: (0, 0)),    # conv2 matmul weight
        ],
        out_specs=pl.BlockSpec((BC, HW), lambda i: (0, 0)),
    )(x2d, aff, masks, w1b, w2b)

    return out2d.reshape(B, C, H, W)


def reference_forward(x_nchw, params):
    """Pure-JAX reference (inference semantics), NCHW throughout."""
    scale = params["gamma"] / jnp.sqrt(params["rvar"] + EPS)
    shift = params["beta"] - params["rmean"] * scale
    h = x_nchw * scale[None, :, None, None] + shift[None, :, None, None]
    h = jnp.maximum(h, 0.0)
    h = lax.conv_general_dilated(
        h, params["w1"], (1, 1), "SAME",
        dimension_numbers=("NCHW", "OIHW", "NCHW"),
        precision=lax.Precision.HIGHEST) + params["b1"][None, :, None, None]
    h = jnp.maximum(h, 0.0)
    h = lax.conv_general_dilated(
        h, params["w2"], (1, 1), "SAME",
        dimension_numbers=("NCHW", "OIHW", "NCHW"),
        precision=lax.Precision.HIGHEST) + params["b2"][None, :, None, None]
    return h + x_nchw


if __name__ == "__main__":
    B, C, H, W = 2, 4, 16, 16          # residualChannels=4; dropout=0.1, dilation=1 (unused)
    key = jax.random.PRNGKey(0)
    kx, kg, kb, km, kv, kw1, kb1, kw2, kb2 = jax.random.split(key, 9)

    x = jax.random.normal(kx, (B, C, H, W), dtype=jnp.float32)
    params = {
        "gamma": jax.random.uniform(kg, (C,), jnp.float32, 0.5, 1.5),
        "beta":  0.1 * jax.random.normal(kb, (C,), jnp.float32),
        "rmean": 0.1 * jax.random.normal(km, (C,), jnp.float32),
        "rvar":  jax.random.uniform(kv, (C,), jnp.float32, 0.5, 1.5),
        "w1": 0.1 * jax.random.normal(kw1, (C, C, 3, 3), jnp.float32),  # OIHW like PyTorch
        "b1": 0.1 * jax.random.normal(kb1, (C,), jnp.float32),
        "w2": 0.1 * jax.random.normal(kw2, (C, C, 3, 3), jnp.float32),
        "b2": 0.1 * jax.random.normal(kb2, (C,), jnp.float32),
    }

    prepared = prepare_params(params, B, H, W)        # once per parameter set
    out = jax.block_until_ready(residual_with_dropout(x, prepared))

    ref = jax.block_until_ready(reference_forward(x, params))
    assert out.shape == (B, C, H, W) and out.dtype == jnp.float32
    # MXU f32 (HIGHEST precision) typically agrees with the XLA reference to ~1e-6;
    # tolerance is kept at 1e-3 only to stay robust to f32 multi-pass differences.
    assert jnp.allclose(out, ref, atol=1e-3, rtol=1e-3), "mismatch vs pure-JAX reference"

    print("KERNEL_OK")
</pallas_src>

<mosaic_0001>
module attributes {stable_mosaic.version = 11 : i64} {
  func.func @kernel(%arg0: i32, %arg1: memref<8x256xf32, #tpu.memory_space<vmem>>, %arg2: memref<8x4xf32, #tpu.memory_space<vmem>>, %arg3: memref<72x256xf32, #tpu.memory_space<vmem>>, %arg4: memref<8x72xf32, #tpu.memory_space<vmem>>, %arg5: memref<8x72xf32, #tpu.memory_space<vmem>>, %arg6: memref<8x256xf32, #tpu.memory_space<vmem>>) attributes {dimension_semantics = [#tpu.dimension_semantics<arbitrary>], iteration_bounds = array<i64: 1>, scalar_prefetch = 0 : i64, scratch_operands = 0 : i64, tpu.core_type = #tpu.core_type<tc>, window_params = [{pipeline_mode = #tpu.pipeline_mode<synchronous>, transform_indices = @transform_0, window_bounds = array<i64: 8, 256>}, {pipeline_mode = #tpu.pipeline_mode<synchronous>, transform_indices = @transform_1, window_bounds = array<i64: 8, 4>}, {pipeline_mode = #tpu.pipeline_mode<synchronous>, transform_indices = @transform_2, window_bounds = array<i64: 72, 256>}, {pipeline_mode = #tpu.pipeline_mode<synchronous>, transform_indices = @transform_3, window_bounds = array<i64: 8, 72>}, {pipeline_mode = #tpu.pipeline_mode<synchronous>, transform_indices = @transform_4, window_bounds = array<i64: 8, 72>}, {pipeline_mode = #tpu.pipeline_mode<synchronous>, transform_indices = @transform_5, window_bounds = array<i64: 8, 256>}]} {
    %c0 = arith.constant 0 : index
    %c0_0 = arith.constant 0 : index
    %0 = vector.load %arg1[%c0, %c0_0] : memref<8x256xf32, #tpu.memory_space<vmem>>, vector<8x256xf32>
    %c0_1 = arith.constant 0 : index
    %c0_2 = arith.constant 0 : index
    %1 = vector.load %arg2[%c0_1, %c0_2] : memref<8x4xf32, #tpu.memory_space<vmem>>, vector<8x4xf32>
    %c0_3 = arith.constant 0 : index
    %c0_4 = arith.constant 0 : index
    %2 = vector.load %arg3[%c0_3, %c0_4] : memref<72x256xf32, #tpu.memory_space<vmem>>, vector<72x256xf32>
    %3 = vector.extract_strided_slice %1 {offsets = [0, 0], sizes = [8, 1], strides = [1, 1]} : vector<8x4xf32> to vector<8x1xf32>
    %4 = vector.extract_strided_slice %1 {offsets = [0, 1], sizes = [8, 1], strides = [1, 1]} : vector<8x4xf32> to vector<8x1xf32>
    %5 = vector.extract_strided_slice %1 {offsets = [0, 2], sizes = [8, 1], strides = [1, 1]} : vector<8x4xf32> to vector<8x1xf32>
    %6 = vector.extract_strided_slice %1 {offsets = [0, 3], sizes = [8, 1], strides = [1, 1]} : vector<8x4xf32> to vector<8x1xf32>
    %7 = vector.broadcast %3 : vector<8x1xf32> to vector<8x256xf32>
    %8 = arith.mulf %0, %7 : vector<8x256xf32>
    %9 = vector.broadcast %4 : vector<8x1xf32> to vector<8x256xf32>
    %10 = arith.addf %8, %9 : vector<8x256xf32>
    %cst = arith.constant 0.000000e+00 : f32
    %11 = vector.broadcast %cst : f32 to vector<8x256xf32>
    %12 = arith.maximumf %10, %11 : vector<8x256xf32>
    %c0_5 = arith.constant 0 : index
    %c0_6 = arith.constant 0 : index
    %13 = vector.load %arg4[%c0_5, %c0_6] : memref<8x72xf32, #tpu.memory_space<vmem>>, vector<8x72xf32>
    %c17_i32 = arith.constant 17 : i32
    %14 = tpu.dynamic_rotate %12 by %c17_i32 dim 1 : vector<8x256xf32>, i32 -> vector<8x256xf32>
    %c16_i32 = arith.constant 16 : i32
    %15 = tpu.dynamic_rotate %12 by %c16_i32 dim 1 : vector<8x256xf32>, i32 -> vector<8x256xf32>
    %c15_i32 = arith.constant 15 : i32
    %16 = tpu.dynamic_rotate %12 by %c15_i32 dim 1 : vector<8x256xf32>, i32 -> vector<8x256xf32>
    %c1_i32 = arith.constant 1 : i32
    %17 = tpu.dynamic_rotate %12 by %c1_i32 dim 1 : vector<8x256xf32>, i32 -> vector<8x256xf32>
    %c255_i32 = arith.constant 255 : i32
    %18 = tpu.dynamic_rotate %12 by %c255_i32 dim 1 : vector<8x256xf32>, i32 -> vector<8x256xf32>
    %c241_i32 = arith.constant 241 : i32
    %19 = tpu.dynamic_rotate %12 by %c241_i32 dim 1 : vector<8x256xf32>, i32 -> vector<8x256xf32>
    %c240_i32 = arith.constant 240 : i32
    %20 = tpu.dynamic_rotate %12 by %c240_i32 dim 1 : vector<8x256xf32>, i32 -> vector<8x256xf32>
    %c239_i32 = arith.constant 239 : i32
    %21 = tpu.dynamic_rotate %12 by %c239_i32 dim 1 : vector<8x256xf32>, i32 -> vector<8x256xf32>
    %22 = tpu.concatenate %14, %15, %16, %17, %12, %18, %19, %20, %21 in 0 : vector<8x256xf32>, vector<8x256xf32>, vector<8x256xf32>, vector<8x256xf32>, vector<8x256xf32>, vector<8x256xf32>, vector<8x256xf32>, vector<8x256xf32>, vector<8x256xf32> -> vector<72x256xf32>
    %23 = arith.mulf %22, %2 : vector<72x256xf32>
    %cst_7 = arith.constant dense<0.000000e+00> : vector<8x256xf32>
    %24 = tpu.matmul %13, %23, %cst_7 {dimension_numbers = #tpu.dot_dimension_numbers<[1], [0], [0], [1], [0, 0, 1, 1], [], []>, precision = #tpu.contract_precision<fp32>} : vector<8x72xf32>, vector<72x256xf32>, vector<8x256xf32> -> vector<8x256xf32>
    %25 = vector.broadcast %5 : vector<8x1xf32> to vector<8x256xf32>
    %26 = arith.addf %24, %25 : vector<8x256xf32>
    %cst_8 = arith.constant 0.000000e+00 : f32
    %27 = vector.broadcast %cst_8 : f32 to vector<8x256xf32>
    %28 = arith.maximumf %26, %27 : vector<8x256xf32>
    %c0_9 = arith.constant 0 : index
    %c0_10 = arith.constant 0 : index
    %29 = vector.load %arg5[%c0_9, %c0_10] : memref<8x72xf32, #tpu.memory_space<vmem>>, vector<8x72xf32>
    %c17_i32_11 = arith.constant 17 : i32
    %30 = tpu.dynamic_rotate %28 by %c17_i32_11 dim 1 : vector<8x256xf32>, i32 -> vector<8x256xf32>
    %c16_i32_12 = arith.constant 16 : i32
    %31 = tpu.dynamic_rotate %28 by %c16_i32_12 dim 1 : vector<8x256xf32>, i32 -> vector<8x256xf32>
    %c15_i32_13 = arith.constant 15 : i32
    %32 = tpu.dynamic_rotate %28 by %c15_i32_13 dim 1 : vector<8x256xf32>, i32 -> vector<8x256xf32>
    %c1_i32_14 = arith.constant 1 : i32
    %33 = tpu.dynamic_rotate %28 by %c1_i32_14 dim 1 : vector<8x256xf32>, i32 -> vector<8x256xf32>
    %c255_i32_15 = arith.constant 255 : i32
    %34 = tpu.dynamic_rotate %28 by %c255_i32_15 dim 1 : vector<8x256xf32>, i32 -> vector<8x256xf32>
    %c241_i32_16 = arith.constant 241 : i32
    %35 = tpu.dynamic_rotate %28 by %c241_i32_16 dim 1 : vector<8x256xf32>, i32 -> vector<8x256xf32>
    %c240_i32_17 = arith.constant 240 : i32
    %36 = tpu.dynamic_rotate %28 by %c240_i32_17 dim 1 : vector<8x256xf32>, i32 -> vector<8x256xf32>
    %c239_i32_18 = arith.constant 239 : i32
    %37 = tpu.dynamic_rotate %28 by %c239_i32_18 dim 1 : vector<8x256xf32>, i32 -> vector<8x256xf32>
    %38 = tpu.concatenate %30, %31, %32, %33, %28, %34, %35, %36, %37 in 0 : vector<8x256xf32>, vector<8x256xf32>, vector<8x256xf32>, vector<8x256xf32>, vector<8x256xf32>, vector<8x256xf32>, vector<8x256xf32>, vector<8x256xf32>, vector<8x256xf32> -> vector<72x256xf32>
    %39 = arith.mulf %38, %2 : vector<72x256xf32>
    %cst_19 = arith.constant dense<0.000000e+00> : vector<8x256xf32>
    %40 = tpu.matmul %29, %39, %cst_19 {dimension_numbers = #tpu.dot_dimension_numbers<[1], [0], [0], [1], [0, 0, 1, 1], [], []>, precision = #tpu.contract_precision<fp32>} : vector<8x72xf32>, vector<72x256xf32>, vector<8x256xf32> -> vector<8x256xf32>
    %41 = vector.broadcast %6 : vector<8x1xf32> to vector<8x256xf32>
    %42 = arith.addf %40, %41 : vector<8x256xf32>
    %43 = arith.addf %42, %0 : vector<8x256xf32>
    %c0_20 = arith.constant 0 : index
    %c0_21 = arith.constant 0 : index
    %44 = vector.load %arg6[%c0_20, %c0_21] : memref<8x256xf32, #tpu.memory_space<vmem>>, vector<8x256xf32>
    tpu.vector_store %arg6[%c0_20, %c0_21], %43 {strides = array<i32>} : memref<8x256xf32, #tpu.memory_space<vmem>>, vector<8x256xf32>,
    return
  }
  func.func @transform_0(%arg0: i32) -> (i32, i32) {
    %c0_i32 = arith.constant 0 : i32
    %c0_i32_0 = arith.constant 0 : i32
    %c0_i32_1 = arith.constant 0 : i32
    return %c0_i32, %c0_i32_0 : i32, i32
  }
  func.func @transform_1(%arg0: i32) -> (i32, i32) {
    %c0_i32 = arith.constant 0 : i32
    %c0_i32_0 = arith.constant 0 : i32
    %c0_i32_1 = arith.constant 0 : i32
    return %c0_i32, %c0_i32_0 : i32, i32
  }
  func.func @transform_2(%arg0: i32) -> (i32, i32) {
    %c0_i32 = arith.constant 0 : i32
    %c0_i32_0 = arith.constant 0 : i32
    %c0_i32_1 = arith.constant 0 : i32
    return %c0_i32, %c0_i32_0 : i32, i32
  }
  func.func @transform_3(%arg0: i32) -> (i32, i32) {
    %c0_i32 = arith.constant 0 : i32
    %c0_i32_0 = arith.constant 0 : i32
    %c0_i32_1 = arith.constant 0 : i32
    return %c0_i32, %c0_i32_0 : i32, i32
  }
  func.func @transform_4(%arg0: i32) -> (i32, i32) {
    %c0_i32 = arith.constant 0 : i32
    %c0_i32_0 = arith.constant 0 : i32
    %c0_i32_1 = arith.constant 0 : i32
    return %c0_i32, %c0_i32_0 : i32, i32
  }
  func.func @transform_5(%arg0: i32) -> (i32, i32) {
    %c0_i32 = arith.constant 0 : i32
    %c0_i32_0 = arith.constant 0 : i32
    %c0_i32_1 = arith.constant 0 : i32
    return %c0_i32, %c0_i32_0 : i32, i32
  }
}

</mosaic_0001>

<bundles_post_ra>
// kernel: residual_with_dropout.1
= control target key start
LH: loop header
LB: loop body
LE: loop exit
PB: predicated region body
PF: predicated region fallthrough
CT: control target
= control target key end

     0   :  { %v1806_v0 = vmov 0   ;;  %v1807_v2 = vmov 1   ;;  %s1809_s24 = smov 17   ;;  %s1810_s25 = smov 15   ;;  %v2628_v13 = vmov 0.0   ;;  %v61_v14 = vlaneseq  ;;  %s2619_s1 = inlined_call_operand.vmem [shape: f32[8,4], index: 1, kind: input, shape index: {}]   ;;  %s2620_s0 = inlined_call_operand.vmem [shape: f32[8,256], index: 0, kind: input, shape index: {}]   ;;  %s2621_s2 = inlined_call_operand.vmem [shape: f32[72,256], index: 2, kind: input, shape index: {}]   ;;  %s2622_s3 = inlined_call_operand.vmem [shape: f32[8,72], index: 3, kind: input, shape index: {}]   ;;  %s2623_s4 = inlined_call_operand.vmem [shape: f32[8,72], index: 4, kind: input, shape index: {}]   ;;  %s2624_s5 = inlined_call_operand.vmem [shape: f32[8,256], index: 5, kind: output, shape index: {}]  }
   0x1   :  { %1800 = vset.pattern.permute.xlu0 %v1806_v0  ;;  %v1852_v1 = vld [vmem:[%s2619_s1] sm:$0xff]  ;;  %v21_v5 = vld [vmem:[%s2620_s0 + $0x8] sm:$0xff]  ;;  %s1808_s1 = smov 16   ;;  %s1811_s26 = smov 1   ;;  %223 = vmatprep.mubr.f32.mxu0 %v2628_v13  ;;  %v1817_v24 = vmov 2   ;;  %v1911_v25 = vld [vmem:[%s2621_s2 + $0x10] sm:$0xff] }
   0x2   :  { %43 = vperm.xlu0 %1800, %v1852_v1   ;;  %v20_v4 = vld [vmem:[%s2620_s0] sm:$0xff]  ;;  %s1812_s27 = smov 127   ;;  %s1813_s28 = smov 113   ;;  %972 = vmatprep.mubr.f32.mxu1 %v2628_v13  ;;  %v1890_v15 = vand.u32 127, %v61_v14  ;;  %v1901_v21 = vld [vmem:[%s2621_s2 + $0x8] sm:$0xff]  ;;  %v1916_v26 = vld [vmem:[%s2621_s2 + $0x18] sm:$0xff] }
   0x3   :  { %s1814_s29 = smov 112   ;;  %s1815_s30 = smov 111   ;;  %v1896_v20 = vld [vmem:[%s2621_s2] sm:$0xff]  ;;  %1802 = vset.pattern.permute.xlu1 %v1817_v24  ;;  %v1922_v29 = vld [vmem:[%s2621_s2 + $0x48] sm:$0xff]  ;;  %vm137_vm2 = vcmask 588800   ;;  %v1972_v52 = vld [vmem:[%s2621_s2 + $0x30] sm:$0xff] }
   0x4   :  { %vm63_vm0 = vcmp.lt.s32.totalorder %v1890_v15, 17  ;;  %vm70_vm1 = vcmp.lt.s32.totalorder %v1890_v15, 16  ;;  %v1935_v34 = vld [vmem:[%s2621_s2 + $0x40] sm:$0xff]  ;;  %vm77_vm3 = vcmp.lt.s32.totalorder %v1890_v15, 15  ;;  %v1960_v48 = vld [vmem:[%s2621_s2 + $0x28] sm:$0xff]  ;;  %vm84_vm4 = vcmp.lt.s32.totalorder %v1890_v15, 1 }
   0x5   :  { %v56_v37 = vld [vmem:[%s2622_s3] sm:$0xff]  ;;  %v1977_v53 = vld [vmem:[%s2621_s2 + $0x38] sm:$0xff]  ;;  %vm91_vm5 = vcmp.lt.s32.totalorder %v1890_v15, 127  ;;  %vm98_vm6 = vcmp.lt.s32.totalorder %v1890_v15, 113  ;;  %vm105_vm7 = vcmp.lt.s32.totalorder %v1890_v15, 112  ;;  %vm112_vm8 = vcmp.lt.s32.totalorder %v1890_v15, 111 }
   0x6   :  { %1801 = vset.pattern.permute.xlu0 %v1807_v2  ;;  %v139_v45 = vsel %vm137_vm2, %v56_v37, 0  ;;  %v1955_v47 = vld [vmem:[%s2621_s2 + $0x20] sm:$0xff]  ;;  %2647 = vst [vmem:[#allocation2_spill] sm:$0xff] %v1977_v53  ;;  %v2001_v2 = vld [vmem:[%s2621_s2 + $0x50] sm:$0xff] }
   0x7   :  { %49 = vperm.xlu0 %1801, %v1852_v1   ;;  %v1983_v58 = vand.u32 4294901760, %v139_v45  ;;  %2648 = vst [vmem:[#allocation3_spill] sm:$0xff] %v2001_v2 }
  0x81   :  { %v44_v3 = vpop.permute.xlu0 %43 }
  0x82   :  { %v46_v6 = vmul.f32 %v44_v3, %v20_v4  ;;  %v47_v7 = vmul.f32 %v44_v3, %v21_v5 }
  0x86   :  { %v50_v8 = vpop.permute.xlu0 %49 }
  0x87   :  { %v52_v9 = vadd.f32 %v50_v8, %v46_v6  ;;  %v53_v10 = vadd.f32 %v50_v8, %v47_v7  ;;  %v2009_v7 = vld [vmem:[%s2621_s2 + $0x58] sm:$0xff] }
  0x88   :  { %2649 = vst [vmem:[#allocation4_spill] sm:$0xff] %v2009_v7 }
  0x89   :  { %v1862_v11 = vmax.f32 %v52_v9, 0.0  ;;  %v55_v12 = vmax.f32 %v53_v10, 0.0  ;;  %v2015_v10 = vsub.f32 %v139_v45, %v1983_v58 }
  0x8b   :  { %68 = vrot.lane.b32.xlu0 %v55_v12, %s1808_s1  ;;  %57 = vrot.lane.b32.xlu1 %v1862_v11, %s1809_s24  ;;  %v1944_v38 = vmul.f32 %v55_v12, %v1922_v29  ;;  %v1948_v42 = vmul.f32 %v1862_v11, %v1935_v34 }
  0x8d   :  { %v157_v55 = vand.u32 4294901760, %v1944_v38  ;;  %v159_v57 = vand.u32 4294901760, %v1948_v42 }
  0x8f   :  { %75 = vrot.lane.b32.xlu0 %v55_v12, %s1810_s25  ;;  %59 = vrot.lane.b32.xlu1 %v55_v12, %s1809_s24  ;;  %v2004_v3 = vsub.f32 %v1944_v38, %v157_v55  ;;  %v2012_v9 = vsub.f32 %v1948_v42, %v159_v57 }
  0x93   :  { %82 = vrot.lane.b32.xlu0 %v55_v12, %s1811_s26  ;;  %66 = vrot.lane.b32.xlu1 %v1862_v11, %s1808_s1 }
  0x97   :  { %89 = vrot.lane.b32.xlu0 %v55_v12, %s1812_s27  ;;  %73 = vrot.lane.b32.xlu1 %v1862_v11, %s1810_s25 }
  0x9b   :  { %96 = vrot.lane.b32.xlu0 %v55_v12, %s1813_s28  ;;  %80 = vrot.lane.b32.xlu1 %v1862_v11, %s1811_s26 }
  0x9f   :  { %103 = vrot.lane.b32.xlu0 %v55_v12, %s1814_s29  ;;  %87 = vrot.lane.b32.xlu1 %v1862_v11, %s1812_s27 }
  0xa3   :  { %110 = vrot.lane.b32.xlu0 %v55_v12, %s1815_s30  ;;  %94 = vrot.lane.b32.xlu1 %v1862_v11, %s1813_s28 }
  0xa7   :  { %101 = vrot.lane.b32.xlu1 %v1862_v11, %s1814_s29 }
  0xab   :  { %108 = vrot.lane.b32.xlu1 %v1862_v11, %s1815_s30 }
  0xaf   :  { %134 = vperm.xlu1 %1802, %v1852_v1  }
  0xfd   :  { %v69_v16 = vpop.permute.xlu0 %68  ;;  %v58_v17 = vpop.permute.xlu1 %57 }
 0x101   :  { %v76_v18 = vpop.permute.xlu0 %75  ;;  %v60_v19 = vpop.permute.xlu1 %59 }
 0x102   :  { %v64_v22 = vsel %vm63_vm0, %v58_v17, %v60_v19  ;;  %v65_v23 = vsel %vm63_vm0, %v60_v19, %v58_v17 }
 0x103   :  { %v1925_v30 = vmul.f32 %v65_v23, %v1896_v20  ;;  %v116_v31 = vmul.f32 %v64_v22, %v1901_v21 }
 0x105   :  { %v83_v27 = vpop.permute.xlu0 %82  ;;  %v67_v28 = vpop.permute.xlu1 %66  ;;  %v141_v43 = vand.u32 4294901760, %v116_v31  ;;  %v143_v44 = vand.u32 4294901760, %v1925_v30 }
 0x106   :  { %v71_v32 = vsel %vm70_vm1, %v67_v28, %v69_v16  ;;  %v72_v33 = vsel %vm70_vm1, %v69_v16, %v67_v28 }
 0x107   :  { %v117_v35 = vmul.f32 %v72_v33, %v1911_v25  ;;  %v118_v36 = vmul.f32 %v71_v32, %v1916_v26  ;;  %v2022_v17 = vsub.f32 %v116_v31, %v141_v43  ;;  %v2625_v33 = vand.u32 4294901760, %v2015_v10 }
 0x108   :  { %v2038_v37 = vsub.f32 %v1925_v30, %v143_v44  ;;  %v2054_v30 = vld [vmem:[%s2621_s2 + $0x60] sm:$0xff] }
 0x109   :  { %v145_v39 = vand.u32 4294901760, %v118_v36  ;;  %v147_v40 = vand.u32 4294901760, %v117_v35  ;;  %v74_v41 = vpop.permute.xlu1 %73  ;;  %v90_v46 = vpop.permute.xlu0 %89  ;;  %2651 = vst [vmem:[#allocation6_spill] sm:$0xff] %v2054_v30 }
 0x10a   :  { %v78_v49 = vsel %vm77_vm3, %v74_v41, %v76_v18  ;;  %v79_v50 = vsel %vm77_vm3, %v76_v18, %v74_v41 }
 0x10b   :  { %v1967_v51 = vpack.c.bf16 %v145_v39, %v141_v43  ;;  %v1979_v54 = vpack.c.bf16 %v147_v40, %v143_v44  ;;  %v1986_v59 = vmul.f32 %v79_v50, %v1955_v47  ;;  %v120_v60 = vmul.f32 %v78_v49, %v1960_v48 }
 0x10c   :  { %v2026_v19 = vsub.f32 %v117_v35, %v147_v40  ;;  %v2044_v35 = vld [vmem:[%s2621_s2 + $0x68] sm:$0xff]  ;;  %v2627_v43 = vand.u32 4294901760, %v2022_v17 }
 0x10d   :  { %v81_v56 = vpop.permute.xlu1 %80  ;;  %1572 = vmatprep.subr.bf16.mxu0 %v1967_v51  ;;  %v97_v4 = vpop.permute.xlu0 %96  ;;  %v149_v11 = vand.u32 4294901760, %v120_v60  ;;  %v151_v12 = vand.u32 4294901760, %v1986_v59  ;;  %2650 = vst [vmem:[#allocation5_spill] sm:$0xff] %v2044_v35 }
 0x10e   :  { %v85_v61 = vsel %vm84_vm4, %v81_v56, %v83_v27  ;;  %v86_v62 = vsel %vm84_vm4, %v83_v27, %v81_v56  ;;  %1574 = vmatpush1.bf16.msra.mxu0 %v1979_v54  ;;  %v2033_v27 = vsub.f32 %v118_v36, %v145_v39  ;;  %v2626_v44 = vand.u32 4294901760, %v2026_v19 }
 0x10f   :  { %v121_v63 = vmul.f32 %v86_v62, %v1972_v52  ;;  %v122_v0 = vmul.f32 %v85_v61, %v1977_v53  ;;  %v2072_v50 = vsub.f32 %v120_v60, %v149_v11  ;;  %v2078_v61 = vld [vmem:[%s2621_s2 + $0x78] sm:$0xff] }
 0x110   :  { %2653 = vst [vmem:[#allocation8_spill] sm:$0xff] %v2078_v61  ;;  %v2630_v62 = vand.u32 4294901760, %v2033_v27 }
 0x111   :  { %v153_v5 = vand.u32 4294901760, %v122_v0  ;;  %v155_v6 = vand.u32 4294901760, %v121_v63  ;;  %v88_v8 = vpop.permute.xlu1 %87  ;;  %v104_v41 = vpop.permute.xlu0 %103 }
 0x112   :  { %v92_v14 = vsel %vm91_vm5, %v88_v8, %v90_v46  ;;  %v93_v16 = vsel %vm91_vm5, %v90_v46, %v88_v8  ;;  %v2067_v46 = vld [vmem:[%s2621_s2 + $0x70] sm:$0xff] }
 0x113   :  { %v125_v18 = vmul.f32 %v92_v14, %v2001_v2  ;;  %v126_v22 = vmul.f32 %v93_v16, %v2009_v7  ;;  %v2029_v23 = vpack.c.bf16 %v153_v5, %v149_v11  ;;  %v2031_v24 = vpack.c.bf16 %v155_v6, %v151_v12  ;;  %2652 = vst [vmem:[#allocation7_spill] sm:$0xff] %v2067_v46 }
 0x114   :  { %v2049_v40 = vsub.f32 %v122_v0, %v153_v5  ;;  %v2084_v0 = vsub.f32 %v2015_v10, %v2625_v33  ;;  %v2093_v8 = vsub.f32 %v121_v63, %v155_v6  ;;  %v238_v14 = vsub.f32 %v2022_v17, %v2627_v43  ;;  %v2113_v6 = vld [vmem:[%s2621_s2 + $0x88] sm:$0xff] }
 0x115   :  { %v163_v28 = vand.u32 4294901760, %v125_v18  ;;  %v95_v32 = vpop.permute.xlu1 %94  ;;  %v161_v38 = vand.u32 4294901760, %v126_v22  ;;  %1576 = vmatprep.subr.bf16.mxu0 %v2029_v23  ;;  %2654 = vst [vmem:[#allocation9_spill] sm:$0xff] %v2113_v6  ;;  %v2664_v2 = vand.u32 4294901760, %v2012_v9 }
 0x116   :  { %v100_v36 = vsel %vm98_vm6, %v97_v4, %v95_v32  ;;  %v99_v42 = vsel %vm98_vm6, %v95_v32, %v97_v4  ;;  %1578 = vmatpush1.bf16.msra.mxu0 %v2031_v24  ;;  %v2633_v16 = vand.u32 4294901760, %v2049_v40  ;;  %v256_v32 = vsub.f32 %v2026_v19, %v2626_v44 }
 0x117   :  { %v2062_v45 = vpack.c.bf16 %v161_v38, %v157_v55  ;;  %v2069_v49 = vpack.c.bf16 %v163_v28, %v159_v57  ;;  %v128_v56 = vmul.f32 %v100_v36, %v2044_v35  ;;  %v127_v60 = vmul.f32 %v99_v42, %v2054_v30  ;;  %v111_v42 = vpop.permute.xlu0 %110 }
 0x118   :  { %v2105_v36 = vsub.f32 %v1986_v59, %v151_v12  ;;  %v250_v44 = vsub.f32 %v2033_v27, %v2630_v62  ;;  %v2129_v39 = vsub.f32 %v125_v18, %v163_v28  ;;  %v274_v31 = vsub.f32 %v2049_v40, %v2633_v16 }
 0x119   :  { %v102_v55 = vpop.permute.xlu1 %101  ;;  %1580 = vmatprep.subr.bf16.mxu0 %v2062_v45  ;;  %v167_v12 = vand.u32 4294901760, %v127_v60  ;;  %v2657_v16 = vand.u32 4294901760, %v2072_v50 }
 0x11a   :  { %v106_v4 = vsel %vm105_vm7, %v102_v55, %v104_v41  ;;  %v107_v5 = vsel %vm105_vm7, %v104_v41, %v102_v55  ;;  %1582 = vmatpush1.bf16.msra.mxu0 %v2069_v49  ;;  %v2107_v41 = vsub.f32 %v126_v22, %v161_v38  ;;  %v165_v55 = vand.u32 4294901760, %v128_v56  ;;  %v2122_v38 = vld [vmem:[%s2621_s2 + $0x80] sm:$0xff] }
 0x11b   :  { %v129_v11 = vmul.f32 %v106_v4, %v2067_v46  ;;  %v130_v63 = vmul.f32 %v107_v5, %v2078_v61  ;;  %2655 = vst [vmem:[#allocation10_spill] sm:$0xff] %v2122_v38  ;;  %v262_v46 = vsub.f32 %v2072_v50, %v2657_v16  ;;  %v2660_v30 = vand.u32 4294901760, %v2105_v36 }
 0x11c   :  { %v2149_v13 = vsub.f32 %v128_v56, %v165_v55  ;;  %v257_v56 = vand.u32 4294901760, %v256_v32  ;;  %v2171_v18 = vsub.f32 %v127_v60, %v167_v12 }
 0x11d   :  { %v171_v4 = vand.u32 4294901760, %v129_v11  ;;  %v109_v33 = vpop.permute.xlu1 %108  ;;  %v169_v22 = vand.u32 4294901760, %v130_v63  ;;  %v263_v35 = vand.u32 4294901760, %v262_v46 }
 0x11e   :  { %v113_v5 = vsel %vm112_vm8, %v109_v33, %v111_v42  ;;  %v114_v43 = vsel %vm112_vm8, %v111_v42, %v109_v33  ;;  %v2656_v33 = vand.u32 4294901760, %v2038_v37  ;;  %v2640_v7 = vand.u32 4294901760, %v2149_v13 }
 0x11f   :  { %v132_v62 = vmul.f32 %v114_v43, %v2113_v6  ;;  %v2135_v59 = vsub.f32 %v130_v63, %v169_v22  ;;  %v2137_v57 = vpack.c.bf16 %v169_v22, %v165_v55  ;;  %v2139_v61 = vpack.c.bf16 %v171_v4, %v167_v12 }
 0x120   :  { %v244_v42 = vsub.f32 %v2038_v37, %v2656_v33  ;;  %v131_v28 = vmul.f32 %v113_v5, %v2122_v38  ;;  %v251_v63 = vand.u32 4294901760, %v250_v44  ;;  %v228_v22 = vand.u32 4294901760, %v2084_v0 }
 0x121   :  { %v2147_v43 = vand.u32 4294901760, %v132_v62  ;;  %1584 = vmatprep.subr.bf16.mxu0 %v2137_v57  ;;  %v2658_v6 = vand.u32 4294901760, %v2093_v8  ;;  %v2160_v5 = vsub.f32 %v129_v11, %v171_v4  ;;  %v239_v44 = vand.u32 4294901760, %v238_v14 }
 0x122   :  { %1586 = vmatpush1.bf16.msra.mxu0 %v2139_v61  ;;  %v275_v55 = vand.u32 4294901760, %v274_v31  ;;  %v2659_v0 = vand.u32 4294901760, %v2107_v41  ;;  %v2173_v11 = vand.u32 4294901760, %v131_v28  ;;  %v245_v4 = vand.u32 4294901760, %v244_v42 }
 0x123   :  { %v280_v33 = vsub.f32 %v2093_v8, %v2658_v6  ;;  %174 = vmatprep.subr.mxu0 %v2147_v43  ;;  %v268_v6 = vsub.f32 %v2105_v36, %v2660_v30  ;;  %v1587_v32 = vpack.c.bf16 %v251_v63, %v239_v44  ;;  %v2661_v14 = vand.u32 4294901760, %v2004_v3 }
 0x124   :  { %v298_v38 = vsub.f32 %v2107_v41, %v2659_v0  ;;  %v2662_v0 = vand.u32 4294901760, %v2129_v39  ;;  %v1589_v30 = vpack.c.bf16 %v257_v56, %v245_v4  ;;  %v2185_v12 = vsub.f32 %v132_v62, %v2147_v43 }
 0x125   :  { %v286_v31 = vsub.f32 %v2004_v3, %v2661_v14  ;;  %v281_v60 = vand.u32 4294901760, %v280_v33  ;;  %v1591_v46 = vpack.c.bf16 %v275_v55, %v263_v35  ;;  %v2663_v63 = vand.u32 4294901760, %v2135_v59 }
 0x126   :  { %v304_v16 = vsub.f32 %v2129_v39, %v2662_v0  ;;  %176 = vmatpush1.msra.mxu0 %v2173_v11  ;;  %v299_v42 = vand.u32 4294901760, %v298_v38  ;;  %v315_v14 = vand.u32 4294901760, %v2171_v18  ;;  %v269_v0 = vand.u32 4294901760, %v268_v6 }
 0x127   :  { %1588 = vmatprep.subr.bf16.mxu0 %v1587_v32  ;;  %229 = vmatmul.mubr.f32.vlgmr.msra.gmra.mrb[0].mxu0 %v228_v22  ;;  %v322_v44 = vsub.f32 %v2135_v59, %v2663_v63  ;;  %v292_v56 = vsub.f32 %v2012_v9, %v2664_v2  ;;  %v2665_v33 = vmov 0.0   ;;  %v287_v62 = vand.u32 4294901760, %v286_v31 }
 0x128   :  { %1590 = vmatpush1.bf16.msra.mxu0 %v1589_v30  ;;  %389 = vmatprep.mubr.f32.mxu0 %v2665_v33  ;;  %v310_v35 = vsub.f32 %v2149_v13, %v2640_v7  ;;  %v2666_v38 = vand.u32 4294901760, %v2160_v5  ;;  %v2202_v55 = vsub.f32 %v131_v28, %v2173_v11  ;;  %v1593_v6 = vpack.c.bf16 %v281_v60, %v269_v0 }
 0x129   :  { %1592 = vmatprep.subr.bf16.mxu0 %v1591_v46  ;;  %v305_v4 = vand.u32 4294901760, %v304_v16  ;;  %v1595_v32 = vpack.c.bf16 %v299_v42, %v287_v62  ;;  %v323_v30 = vand.u32 4294901760, %v322_v44  ;;  %v333_v2 = vand.u32 4294901760, %v2185_v12 }
 0x12a   :  { %v328_v22 = vsub.f32 %v2160_v5, %v2666_v38  ;;  %v316_v31 = vsub.f32 %v2171_v18, %v315_v14  ;;  %v293_v46 = vand.u32 4294901760, %v292_v56  ;;  %v311_v63 = vand.u32 4294901760, %v310_v35 }
 0x12b   :  { %v339_v7 = vand.u32 4294901760, %v2202_v55  ;;  %v334_v16 = vsub.f32 %v2185_v12, %v333_v2  ;;  %v1603_v62 = vpack.c.bf16 %v2033_v27, %v2022_v17  ;;  %v1605_v35 = vpack.c.bf16 %v2026_v19, %v2038_v37 }
 0x12c   :  { %1594 = vmatpush1.bf16.msra.mxu0 %v1593_v6  ;;  %v1597_v38 = vpack.c.bf16 %v305_v4, %v293_v46  ;;  %v329_v53 = vand.u32 4294901760, %v328_v22  ;;  %v1599_v28 = vpack.c.bf16 %v323_v30, %v311_v63  ;;  %v317_v60 = vand.u32 4294901760, %v316_v31 }
 0x12d   :  { %1596 = vmatprep.subr.bf16.mxu0 %v1595_v32  ;;  %v340_v44 = vsub.f32 %v2202_v55, %v339_v7  ;;  %v335_v0 = vand.u32 4294901760, %v334_v16  ;;  %v1609_v22 = vpack.c.bf16 %v2093_v8, %v2105_v36  ;;  %v1611_v6 = vpack.c.bf16 %v2107_v41, %v2004_v3 }
 0x12e   :  { %v1601_v42 = vpack.c.bf16 %v329_v53, %v317_v60  ;;  %v1607_v53 = vpack.c.bf16 %v2049_v40, %v2072_v50  ;;  %v1613_v4 = vpack.c.bf16 %v2129_v39, %v2012_v9  ;;  %v1615_v32 = vpack.c.bf16 %v2135_v59, %v2149_v13 }
 0x12f   :  { %v341_v56 = vand.u32 4294901760, %v340_v44  ;;  %v1617_v30 = vpack.c.bf16 %v2160_v5, %v2171_v18  ;;  %v2667_v31 = vand.u32 4294901760, %v2022_v17  ;;  %v2668_v46 = vand.u32 4294901760, %v2033_v27 }
 0x130   :  { %1598 = vmatpush1.bf16.msra.mxu0 %v1597_v38  ;;  %v2669_v38 = vand.u32 4294901760, %v2038_v37  ;;  %v2671_v60 = vand.u32 4294901760, %v2015_v10  ;;  %v2673_v44 = vand.u32 4294901760, %v2049_v40  ;;  %v2674_v17 = vand.u32 4294901760, %v2105_v36 }
 0x131   :  { %1600 = vmatprep.subr.bf16.mxu0 %v1599_v28  ;;  %v1635_v63 = vpack.c.bf16 %v2668_v46, %v2667_v31  ;;  %v2670_v28 = vand.u32 4294901760, %v2026_v19  ;;  %v2675_v27 = vand.u32 4294901760, %v2093_v8  ;;  %v2676_v19 = vand.u32 4294901760, %v2004_v3 }
 0x132   :  { %v2679_v40 = vand.u32 4294901760, %v2129_v39  ;;  %v2682_v3 = vand.u32 4294901760, %v2160_v5 }
 0x133   :  { %v1637_v16 = vpack.c.bf16 %v2670_v28, %v2669_v38  ;;  %v1641_v37 = vpack.c.bf16 %v2675_v27, %v2674_v17 }
 0x134   :  { %1602 = vmatpush1.bf16.msra.mxu0 %v1601_v42  ;;  %v2672_v42 = vand.u32 4294901760, %v2072_v50  ;;  %v2678_v50 = vand.u32 4294901760, %v2012_v9  ;;  %v1649_v8 = vpack.c.bf16 %v2682_v3, %v315_v14  ;;  %v816_v14 = vld [vmem:[%s2623_s4] sm:$0xff] }
 0x135   :  { %336 = vmatprep.subr.mxu0 %v335_v0 }
 0x136   :  { %v1639_v0 = vpack.c.bf16 %v2673_v44, %v2672_v42  ;;  %v2683_v42 = vld [vmem:[#allocation2_spill] sm:$0xff] }
 0x138   :  { %342 = vmatpush1.msra.mxu0 %v341_v56  ;;  %v2677_v56 = vand.u32 4294901760, %v2107_v41 }
 0x139   :  { %1604 = vmatprep.subr.bf16.mxu0 %v1603_v62  ;;  %391 = vmatmul.mubr.f32.vlgmr.msra.gmra.mrb[0].mxu0 %v1983_v58  ;;  %v1645_v62 = vpack.c.bf16 %v2679_v40, %v2678_v50 }
 0x13a   :  { %1606 = vmatpush1.bf16.msra.mxu0 %v1605_v35  ;;  %497 = vmatprep.mubr.f32.mxu0 %v2665_v33  ;;  %v2680_v35 = vand.u32 4294901760, %v2149_v13  ;;  %v135_v13 = vpop.permute.xlu1 %134 }
 0x13b   :  { %1608 = vmatprep.subr.bf16.mxu0 %v1607_v53  ;;  %v2681_v53 = vand.u32 4294901760, %v2135_v59 }
 0x13d   :  { %v1647_v36 = vpack.c.bf16 %v2681_v53, %v2680_v35 }
 0x13e   :  { %1610 = vmatpush1.bf16.msra.mxu0 %v1609_v22 }
 0x13f   :  { %1612 = vmatprep.subr.bf16.mxu0 %v1611_v6  ;;  %v888_v6 = vsel %vm137_vm2, %v816_v14, 0 }
 0x140   :  { %v2342_v38 = vand.u32 4294901760, %v888_v6 }
 0x142   :  { %1614 = vmatpush1.bf16.msra.mxu0 %v1613_v4 }
 0x143   :  { %1616 = vmatprep.subr.bf16.mxu0 %v1615_v32 }
 0x146   :  { %1618 = vmatpush1.bf16.msra.mxu0 %v1617_v30 }
 0x147   :  { %447 = vmatprep.subr.mxu0 %v2185_v12 }
 0x14a   :  { %450 = vmatpush1.msra.mxu0 %v2202_v55 }
 0x14b   :  { %1620 = vmatprep.subr.bf16.mxu0 %v1967_v51  ;;  %500 = vmatmul.mubr.f32.vlgmr.msra.gmra.mrb[0].mxu0 %v2015_v10  ;;  %v1643_v10 = vpack.c.bf16 %v2677_v56, %v2676_v19  ;;  %v2355_v19 = vsub.f32 %v888_v6, %v2342_v38  ;;  %v2687_v6 = vld [vmem:[#allocation6_spill] sm:$0xff] }
 0x14c   :  { %1622 = vmatpush1.bf16.msra.mxu0 %v1979_v54  ;;  %588 = vmatprep.mubr.f32.mxu0 %v2665_v33 }
 0x14d   :  { %1624 = vmatprep.subr.bf16.mxu0 %v2029_v23 }
 0x150   :  { %1626 = vmatpush1.bf16.msra.mxu0 %v2031_v24 }
 0x151   :  { %1628 = vmatprep.subr.bf16.mxu0 %v2062_v45 }
 0x154   :  { %1630 = vmatpush1.bf16.msra.mxu0 %v2069_v49 }
 0x155   :  { %1632 = vmatprep.subr.bf16.mxu0 %v2137_v57 }
 0x158   :  { %1634 = vmatpush1.bf16.msra.mxu0 %v2139_v61 }
 0x159   :  { %539 = vmatprep.subr.mxu0 %v2147_v43 }
 0x15c   :  { %541 = vmatpush1.msra.mxu0 %v2173_v11 }
 0x15d   :  { %1636 = vmatprep.subr.bf16.mxu0 %v1635_v63  ;;  %592 = vmatmul.mubr.f32.vlgmr.msra.gmra.mrb[0].mxu0 %v2671_v60 }
 0x15e   :  { %1638 = vmatpush1.bf16.msra.mxu0 %v1637_v16  ;;  %716 = vmatprep.mubr.f32.mxu0 %v2665_v33 }
 0x15f   :  { %1640 = vmatprep.subr.bf16.mxu0 %v1639_v0 }
 0x162   :  { %1642 = vmatpush1.bf16.msra.mxu0 %v1641_v37 }
 0x163   :  { %1644 = vmatprep.subr.bf16.mxu0 %v1643_v10 }
 0x166   :  { %1646 = vmatpush1.bf16.msra.mxu0 %v1645_v62  ;;  %v2684_v62 = vld [vmem:[#allocation3_spill] sm:$0xff] }
 0x167   :  { %1648 = vmatprep.subr.bf16.mxu0 %v1647_v36 }
 0x16a   :  { %1650 = vmatpush1.bf16.msra.mxu0 %v1649_v8  ;;  %v2685_v8 = vld [vmem:[#allocation4_spill] sm:$0xff] }
 0x16b   :  { %665 = vmatprep.subr.mxu0 %v333_v2 }
 0x16e   :  { %669 = vmatpush1.msra.mxu0 %v339_v7 }
 0x16f   :  { %1652 = vmatprep.subr.bf16.mxu0 %v1967_v51  ;;  %718 = vmatmul.mubr.f32.vlgmr.msra.gmra.mrb[0].mxu0 %v1983_v58 }
 0x170   :  { %1654 = vmatpush1.bf16.msra.mxu0 %v1979_v54  ;;  %806 = vmatprep.mubr.f32.mxu0 %v2665_v33 }
 0x171   :  { %1656 = vmatprep.subr.bf16.mxu0 %v2029_v23 }
 0x174   :  { %1658 = vmatpush1.bf16.msra.mxu0 %v2031_v24 }
 0x175   :  { %1660 = vmatprep.subr.bf16.mxu0 %v2062_v45 }
 0x178   :  { %1662 = vmatpush1.bf16.msra.mxu0 %v2069_v49 }
 0x179   :  { %1664 = vmatprep.subr.bf16.mxu0 %v2137_v57 }
 0x17c   :  { %1666 = vmatpush1.bf16.msra.mxu0 %v2139_v61  ;;  %v1818_v61 = vmov 3  }
 0x17d   :  { %757 = vmatprep.subr.mxu0 %v2147_v43  ;;  %1803 = vset.pattern.permute.xlu0 %v1818_v61 }
 0x180   :  { %759 = vmatpush1.msra.mxu0 %v2173_v11 }
 0x181   :  { %808 = vmatmul.mubr.f32.vlgmr.msra.gmra.mrb[0].mxu0 %v1983_v58 }
 0x254   :  { %v809_v51 = vpop.f32.mrb[0].mxu0 }
 0x255   :  { %v1763_v54 = vadd.f32 %v809_v51, %v135_v13  ;;  %v811_v7 = vpop.f32.mrb[1].mxu0 }
 0x256   :  { %v1764_v9 = vadd.f32 %v811_v7, %v135_v13 }
 0x257   :  { %v814_v23 = vmax.f32 %v1763_v54, 0.0 }
 0x258   :  { %v815_v24 = vmax.f32 %v1764_v9, 0.0 }
 0x259   :  { %817 = vrot.lane.b32.xlu0 %v814_v23, %s1809_s24  ;;  %v873_v32 = vmul.f32 %v814_v23, %v1935_v34 }
 0x25a   :  { %819 = vrot.lane.b32.xlu1 %v815_v24, %s1809_s24 }
 0x25b   :  { %v908_v17 = vand.u32 4294901760, %v873_v32 }
 0x25d   :  { %823 = vrot.lane.b32.xlu0 %v814_v23, %s1808_s1  ;;  %v2366_v36 = vsub.f32 %v873_v32, %v908_v17 }
 0x25e   :  { %825 = vrot.lane.b32.xlu1 %v815_v24, %s1808_s1 }
 0x261   :  { %829 = vrot.lane.b32.xlu0 %v814_v23, %s1810_s25 }
 0x262   :  { %831 = vrot.lane.b32.xlu1 %v815_v24, %s1810_s25 }
 0x265   :  { %835 = vrot.lane.b32.xlu0 %v814_v23, %s1811_s26 }
 0x266   :  { %837 = vrot.lane.b32.xlu1 %v815_v24, %s1811_s26 }
 0x269   :  { %841 = vrot.lane.b32.xlu0 %v814_v23, %s1812_s27 }
 0x26a   :  { %843 = vrot.lane.b32.xlu1 %v815_v24, %s1812_s27 }
 0x26d   :  { %847 = vrot.lane.b32.xlu0 %v814_v23, %s1813_s28 }
 0x26e   :  { %849 = vrot.lane.b32.xlu1 %v815_v24, %s1813_s28 }
 0x271   :  { %853 = vrot.lane.b32.xlu0 %v814_v23, %s1814_s29 }
 0x272   :  { %855 = vrot.lane.b32.xlu1 %v815_v24, %s1814_s29 }
 0x275   :  { %859 = vrot.lane.b32.xlu0 %v814_v23, %s1815_s30 }
 0x276   :  { %861 = vrot.lane.b32.xlu1 %v815_v24, %s1815_s30 }
 0x279   :  { %884 = vperm.xlu0 %1803, %v1852_v1  }
 0x2cb   :  { %v818_v58 = vpop.permute.xlu0 %817 }
 0x2cc   :  { %v820_v39 = vpop.permute.xlu1 %819 }
 0x2cd   :  { %v821_v45 = vsel %vm63_vm0, %v818_v58, %v820_v39  ;;  %v822_v49 = vsel %vm63_vm0, %v820_v39, %v818_v58  ;;  %v975_v58 = vand.u32 4294901760, %v2355_v19 }
 0x2ce   :  { %v865_v59 = vmul.f32 %v822_v49, %v1896_v20  ;;  %v866_v18 = vmul.f32 %v821_v45, %v1901_v21 }
 0x2cf   :  { %v824_v57 = vpop.permute.xlu0 %823 }
 0x2d0   :  { %v826_v41 = vpop.permute.xlu1 %825  ;;  %v890_v22 = vand.u32 4294901760, %v866_v18  ;;  %v892_v21 = vand.u32 4294901760, %v865_v59 }
 0x2d1   :  { %v827_v43 = vsel %vm70_vm1, %v824_v57, %v826_v41  ;;  %v828_v5 = vsel %vm70_vm1, %v826_v41, %v824_v57 }
 0x2d2   :  { %v867_v11 = vmul.f32 %v828_v5, %v1911_v25  ;;  %v868_v12 = vmul.f32 %v827_v43, %v1916_v26  ;;  %v874_v26 = vmul.f32 %v815_v24, %v1922_v29  ;;  %v2361_v40 = vsub.f32 %v866_v18, %v890_v22 }
 0x2d3   :  { %v830_v1 = vpop.permute.xlu0 %829  ;;  %v2378_v39 = vsub.f32 %v865_v59, %v892_v21  ;;  %v1040_v18 = vand.u32 4294901760, %v2366_v36 }
 0x2d4   :  { %v894_v55 = vand.u32 4294901760, %v868_v12  ;;  %v896_v2 = vand.u32 4294901760, %v867_v11  ;;  %v832_v20 = vpop.permute.xlu1 %831  ;;  %v906_v0 = vand.u32 4294901760, %v874_v26  ;;  %v986_v41 = vand.u32 4294901760, %v2361_v40 }
 0x2d5   :  { %v833_v4 = vsel %vm77_vm3, %v830_v1, %v832_v20  ;;  %v834_v25 = vsel %vm77_vm3, %v832_v20, %v830_v1  ;;  %v2686_v1 = vld [vmem:[#allocation5_spill] sm:$0xff] }
 0x2d6   :  { %v2338_v31 = vpack.c.bf16 %v894_v55, %v890_v22  ;;  %v2340_v46 = vpack.c.bf16 %v896_v2, %v892_v21  ;;  %v869_v28 = vmul.f32 %v834_v25, %v1955_v47  ;;  %v870_v16 = vmul.f32 %v833_v4, %v1960_v48 }
 0x2d7   :  { %v836_v30 = vpop.permute.xlu0 %835  ;;  %v2364_v53 = vsub.f32 %v874_v26, %v906_v0  ;;  %v2368_v3 = vsub.f32 %v867_v11, %v896_v2  ;;  %v2375_v9 = vsub.f32 %v868_v12, %v894_v55  ;;  %v2403_v22 = vsub.f32 %v2355_v19, %v975_v58 }
 0x2d8   :  { %v838_v63 = vpop.permute.xlu1 %837  ;;  %1668 = vmatprep.subr.bf16.mxu1 %v2338_v31  ;;  %v898_v56 = vand.u32 4294901760, %v870_v16  ;;  %v900_v10 = vand.u32 4294901760, %v869_v28  ;;  %v992_v21 = vand.u32 4294901760, %v2378_v39 }
 0x2d9   :  { %v839_v60 = vsel %vm84_vm4, %v836_v30, %v838_v63  ;;  %v840_v29 = vsel %vm84_vm4, %v838_v63, %v836_v30  ;;  %1670 = vmatpush1.bf16.msra.mxu1 %v2340_v46  ;;  %v1004_v59 = vand.u32 4294901760, %v2368_v3  ;;  %v1034_v12 = vand.u32 4294901760, %v2364_v53  ;;  %v2688_v30 = vld [vmem:[#allocation7_spill] sm:$0xff] }
 0x2da   :  { %v871_v34 = vmul.f32 %v840_v29, %v1972_v52  ;;  %v872_v44 = vmul.f32 %v839_v60, %v2683_v42  ;;  %v2396_v14 = vsub.f32 %v870_v16, %v898_v56  ;;  %v998_v20 = vand.u32 4294901760, %v2375_v9 }
 0x2db   :  { %v842_v27 = vpop.permute.xlu0 %841  ;;  %v987_v16 = vsub.f32 %v2361_v40, %v986_v41  ;;  %v1005_v29 = vsub.f32 %v2368_v3, %v1004_v59  ;;  %v2423_v42 = vsub.f32 %v869_v28, %v900_v10  ;;  %v993_v15 = vsub.f32 %v2378_v39, %v992_v21 }
 0x2dc   :  { %v902_v47 = vand.u32 4294901760, %v872_v44  ;;  %v904_v37 = vand.u32 4294901760, %v871_v34  ;;  %v844_v48 = vpop.permute.xlu1 %843 }
 0x2dd   :  { %v845_v50 = vsel %vm91_vm5, %v842_v27, %v844_v48  ;;  %v846_v52 = vsel %vm91_vm5, %v844_v48, %v842_v27  ;;  %v999_v48 = vsub.f32 %v2375_v9, %v998_v20 }
 0x2de   :  { %v875_v35 = vmul.f32 %v845_v50, %v2684_v62  ;;  %v876_v13 = vmul.f32 %v846_v52, %v2685_v8  ;;  %v2371_v54 = vpack.c.bf16 %v902_v47, %v898_v56  ;;  %v2373_v7 = vpack.c.bf16 %v904_v37, %v900_v10 }
 0x2df   :  { %v848_v51 = vpop.permute.xlu0 %847  ;;  %v2383_v61 = vsub.f32 %v872_v44, %v902_v47  ;;  %v2412_v32 = vsub.f32 %v871_v34, %v904_v37  ;;  %v2689_v34 = vld [vmem:[#allocation8_spill] sm:$0xff]  ;;  %v1010_v56 = vand.u32 4294901760, %v2396_v14 }
 0x2e0   :  { %v912_v23 = vand.u32 4294901760, %v875_v35  ;;  %v850_v24 = vpop.permute.xlu1 %849  ;;  %v910_v45 = vand.u32 4294901760, %v876_v13  ;;  %1672 = vmatprep.subr.bf16.mxu1 %v2371_v54 }
 0x2e1   :  { %v852_v49 = vsel %vm98_vm6, %v850_v24, %v848_v51  ;;  %v851_v57 = vsel %vm98_vm6, %v848_v51, %v850_v24  ;;  %1674 = vmatpush1.bf16.msra.mxu1 %v2373_v7  ;;  %v1022_v60 = vand.u32 4294901760, %v2383_v61  ;;  %v1028_v62 = vand.u32 4294901760, %v2412_v32 }
 0x2e2   :  { %v2391_v5 = vpack.c.bf16 %v910_v45, %v906_v0  ;;  %v2393_v11 = vpack.c.bf16 %v912_v23, %v908_v17  ;;  %v878_v55 = vmul.f32 %v852_v49, %v2686_v1  ;;  %v877_v4 = vmul.f32 %v851_v57, %v2687_v6 }
 0x2e3   :  { %v854_v43 = vpop.permute.xlu0 %853  ;;  %v2425_v44 = vsub.f32 %v876_v13, %v910_v45  ;;  %v2437_v8 = vsub.f32 %v875_v35, %v912_v23  ;;  %v2690_v13 = vld [vmem:[#allocation9_spill] sm:$0xff]  ;;  %v1023_v24 = vsub.f32 %v2383_v61, %v1022_v60  ;;  %v1016_v35 = vand.u32 4294901760, %v2423_v42  ;;  %v2691_v23 = vld [vmem:[#allocation10_spill] sm:$0xff] }
 0x2e4   :  { %v856_v2 = vpop.permute.xlu1 %855  ;;  %1676 = vmatprep.subr.bf16.mxu1 %v2391_v5  ;;  %v914_v27 = vand.u32 4294901760, %v878_v55  ;;  %v916_v50 = vand.u32 4294901760, %v877_v4 }
 0x2e5   :  { %v857_v25 = vsel %vm105_vm7, %v854_v43, %v856_v2  ;;  %v858_v26 = vsel %vm105_vm7, %v856_v2, %v854_v43  ;;  %1678 = vmatpush1.bf16.msra.mxu1 %v2393_v11  ;;  %v2642_v43 = vand.u32 4294901760, %v2425_v44 }
 0x2e6   :  { %v879_v63 = vmul.f32 %v857_v25, %v2688_v30  ;;  %v880_v0 = vmul.f32 %v858_v26, %v2689_v34  ;;  %v2457_v6 = vsub.f32 %v878_v55, %v914_v27  ;;  %v1000_v25 = vand.u32 4294901760, %v999_v48 }
 0x2e7   :  { %v860_v17 = vpop.permute.xlu0 %859  ;;  %v977_v26 = vand.u32 4294901760, %v2403_v22  ;;  %v1011_v30 = vsub.f32 %v2396_v14, %v1010_v56  ;;  %v1029_v34 = vsub.f32 %v2412_v32, %v1028_v62  ;;  %v1006_v55 = vand.u32 4294901760, %v1005_v29 }
 0x2e8   :  { %v920_v47 = vand.u32 4294901760, %v879_v63  ;;  %v862_v37 = vpop.permute.xlu1 %861  ;;  %v918_v52 = vand.u32 4294901760, %v880_v0  ;;  %v1047_v22 = vsub.f32 %v2425_v44, %v2642_v43 }
 0x2e9   :  { %v863_v28 = vsel %vm112_vm8, %v860_v17, %v862_v37  ;;  %v864_v10 = vsel %vm112_vm8, %v862_v37, %v860_v17  ;;  %v1024_v37 = vand.u32 4294901760, %v1023_v24 }
 0x2ea   :  { %v882_v51 = vmul.f32 %v864_v10, %v2690_v13  ;;  %v2443_v45 = vsub.f32 %v880_v0, %v918_v52  ;;  %v2445_v49 = vpack.c.bf16 %v918_v52, %v914_v27  ;;  %v2447_v57 = vpack.c.bf16 %v920_v47, %v916_v50 }
 0x2eb   :  { %v881_v1 = vmul.f32 %v863_v28, %v2691_v23  ;;  %v2643_v0 = vand.u32 4294901760, %v2437_v8  ;;  %v2468_v17 = vsub.f32 %v879_v63, %v920_v47  ;;  %v988_v27 = vand.u32 4294901760, %v987_v16 }
 0x2ec   :  { %v2455_v2 = vand.u32 4294901760, %v882_v51  ;;  %1680 = vmatprep.subr.bf16.mxu1 %v2445_v49  ;;  %v2644_v48 = vand.u32 4294901760, %v2443_v45  ;;  %v1017_v52 = vsub.f32 %v2423_v42, %v1016_v35  ;;  %v2479_v28 = vsub.f32 %v877_v4, %v916_v50 }
 0x2ed   :  { %1682 = vmatpush1.bf16.msra.mxu1 %v2447_v57  ;;  %v2481_v63 = vand.u32 4294901760, %v881_v1  ;;  %v994_v47 = vand.u32 4294901760, %v993_v15  ;;  %v1683_v29 = vpack.c.bf16 %v1000_v25, %v988_v27  ;;  %v1012_v10 = vand.u32 4294901760, %v1011_v30 }
 0x2ee   :  { %923 = vmatprep.subr.mxu1 %v2455_v2  ;;  %v1035_v16 = vsub.f32 %v2364_v53, %v1034_v12  ;;  %v2646_v13 = vand.u32 4294901760, %v2457_v6  ;;  %v1053_v24 = vsub.f32 %v2437_v8, %v2643_v0  ;;  %v2645_v23 = vand.u32 4294901760, %v2468_v17 }
 0x2ef   :  { %v1685_v4 = vpack.c.bf16 %v1006_v55, %v994_v47  ;;  %v1030_v50 = vand.u32 4294901760, %v1029_v34  ;;  %v2493_v15 = vsub.f32 %v882_v51, %v2455_v2  ;;  %v1687_v25 = vpack.c.bf16 %v1024_v37, %v1012_v10 }
 0x2f0   :  { %v1048_v30 = vand.u32 4294901760, %v1047_v22  ;;  %v1071_v27 = vsub.f32 %v2443_v45, %v2644_v48  ;;  %v1064_v43 = vand.u32 4294901760, %v2479_v28  ;;  %v1018_v0 = vand.u32 4294901760, %v1017_v52 }
 0x2f1   :  { %925 = vmatpush1.msra.mxu1 %v2481_v63  ;;  %v1041_v55 = vsub.f32 %v2366_v36, %v1040_v18  ;;  %v1036_v51 = vand.u32 4294901760, %v1035_v16  ;;  %v1077_v34 = vsub.f32 %v2468_v17, %v2645_v23  ;;  %v2510_v37 = vsub.f32 %v881_v1, %v2481_v63 }
 0x2f2   :  { %1684 = vmatprep.subr.bf16.mxu1 %v1683_v29  ;;  %978 = vmatmul.mubr.f32.vlgmr.msra.gmra.mrb[0].mxu1 %v977_v26  ;;  %v1059_v26 = vsub.f32 %v2457_v6, %v2646_v13  ;;  %v1689_v22 = vpack.c.bf16 %v1030_v50, %v1018_v0  ;;  %v1054_v52 = vand.u32 4294901760, %v1053_v24  ;;  %v1072_v29 = vand.u32 4294901760, %v1071_v27 }
 0x2f3   :  { %1686 = vmatpush1.bf16.msra.mxu1 %v1685_v4  ;;  %1138 = vmatprep.mubr.f32.mxu1 %v2665_v33  ;;  %v1691_v47 = vpack.c.bf16 %v1048_v30, %v1036_v51  ;;  %v1082_v10 = vand.u32 4294901760, %v2493_v15  ;;  %v1065_v16 = vsub.f32 %v2479_v28, %v1064_v43  ;;  %v1042_v4 = vand.u32 4294901760, %v1041_v55 }
 0x2f4   :  { %1688 = vmatprep.subr.bf16.mxu1 %v1687_v25  ;;  %v1060_v25 = vand.u32 4294901760, %v1059_v26  ;;  %v1088_v48 = vand.u32 4294901760, %v2510_v37  ;;  %v1078_v13 = vand.u32 4294901760, %v1077_v34  ;;  %v1699_v51 = vpack.c.bf16 %v2375_v9, %v2361_v40 }
 0x2f5   :  { %v1693_v23 = vpack.c.bf16 %v1054_v52, %v1042_v4  ;;  %v1083_v0 = vsub.f32 %v2493_v15, %v1082_v10  ;;  %v1066_v24 = vand.u32 4294901760, %v1065_v16  ;;  %v1701_v26 = vpack.c.bf16 %v2368_v3, %v2378_v39 }
 0x2f6   :  { %v1695_v1 = vpack.c.bf16 %v1072_v29, %v1060_v25  ;;  %v1089_v30 = vsub.f32 %v2510_v37, %v1088_v48  ;;  %v1707_v34 = vpack.c.bf16 %v2425_v44, %v2364_v53  ;;  %v1711_v52 = vpack.c.bf16 %v2443_v45, %v2457_v6 }
 0x2f7   :  { %1690 = vmatpush1.bf16.msra.mxu1 %v1689_v22  ;;  %v1697_v50 = vpack.c.bf16 %v1078_v13, %v1066_v24  ;;  %v1084_v27 = vand.u32 4294901760, %v1083_v0  ;;  %v1703_v13 = vpack.c.bf16 %v2383_v61, %v2396_v14  ;;  %v1709_v22 = vpack.c.bf16 %v2437_v8, %v2366_v36 }
 0x2f8   :  { %1692 = vmatprep.subr.bf16.mxu1 %v1691_v47  ;;  %v1090_v55 = vand.u32 4294901760, %v1089_v30  ;;  %v1713_v47 = vpack.c.bf16 %v2468_v17, %v2479_v28  ;;  %v1731_v29 = vpack.c.bf16 %v998_v20, %v986_v41  ;;  %v1733_v16 = vpack.c.bf16 %v1004_v59, %v992_v21 }
 0x2f9   :  { %v1735_v4 = vpack.c.bf16 %v1022_v60, %v1010_v56  ;;  %v1737_v40 = vpack.c.bf16 %v1028_v62, %v1016_v35  ;;  %v2692_v3 = vand.u32 4294901760, %v2425_v44  ;;  %v2693_v9 = vand.u32 4294901760, %v2437_v8 }
 0x2fa   :  { %v2694_v39 = vand.u32 4294901760, %v2457_v6  ;;  %v2695_v61 = vand.u32 4294901760, %v2443_v45  ;;  %v2696_v53 = vand.u32 4294901760, %v2468_v17 }
 0x2fb   :  { %1694 = vmatpush1.bf16.msra.mxu1 %v1693_v23  ;;  %v1705_v23 = vpack.c.bf16 %v2412_v32, %v2423_v42 }
 0x2fc   :  { %1696 = vmatprep.subr.bf16.mxu1 %v1695_v1  ;;  %v1743_v41 = vpack.c.bf16 %v2695_v61, %v2694_v39  ;;  %v1745_v59 = vpack.c.bf16 %v2696_v53, %v1064_v43 }
 0x2ff   :  { %1698 = vmatpush1.bf16.msra.mxu1 %v1697_v50 }
 0x300   :  { %1085 = vmatprep.subr.mxu1 %v1084_v27 }
 0x303   :  { %1091 = vmatpush1.msra.mxu1 %v1090_v55 }
 0x304   :  { %1700 = vmatprep.subr.bf16.mxu1 %v1699_v51  ;;  %1140 = vmatmul.mubr.f32.vlgmr.msra.gmra.mrb[0].mxu1 %v2342_v38 }
 0x305   :  { %1702 = vmatpush1.bf16.msra.mxu1 %v1701_v26  ;;  %1246 = vmatprep.mubr.f32.mxu1 %v2665_v33 }
 0x306   :  { %1704 = vmatprep.subr.bf16.mxu1 %v1703_v13 }
 0x309   :  { %1706 = vmatpush1.bf16.msra.mxu1 %v1705_v23 }
 0x30a   :  { %1708 = vmatprep.subr.bf16.mxu1 %v1707_v34 }
 0x30d   :  { %1710 = vmatpush1.bf16.msra.mxu1 %v1709_v22 }
 0x30e   :  { %1712 = vmatprep.subr.bf16.mxu1 %v1711_v52 }
 0x311   :  { %1714 = vmatpush1.bf16.msra.mxu1 %v1713_v47 }
 0x312   :  { %1196 = vmatprep.subr.mxu1 %v2493_v15 }
 0x315   :  { %1199 = vmatpush1.msra.mxu1 %v2510_v37 }
 0x316   :  { %1716 = vmatprep.subr.bf16.mxu1 %v2338_v31  ;;  %1249 = vmatmul.mubr.f32.vlgmr.msra.gmra.mrb[0].mxu1 %v2355_v19  ;;  %v1739_v19 = vpack.c.bf16 %v2692_v3, %v1034_v12 }
 0x317   :  { %1718 = vmatpush1.bf16.msra.mxu1 %v2340_v46  ;;  %1337 = vmatprep.mubr.f32.mxu1 %v2665_v33 }
 0x318   :  { %1720 = vmatprep.subr.bf16.mxu1 %v2371_v54 }
 0x31b   :  { %1722 = vmatpush1.bf16.msra.mxu1 %v2373_v7 }
 0x31c   :  { %1724 = vmatprep.subr.bf16.mxu1 %v2391_v5 }
 0x31f   :  { %1726 = vmatpush1.bf16.msra.mxu1 %v2393_v11 }
 0x320   :  { %1728 = vmatprep.subr.bf16.mxu1 %v2445_v49 }
 0x323   :  { %1730 = vmatpush1.bf16.msra.mxu1 %v2447_v57 }
 0x324   :  { %1288 = vmatprep.subr.mxu1 %v2455_v2 }
 0x327   :  { %1290 = vmatpush1.msra.mxu1 %v2481_v63 }
 0x328   :  { %1732 = vmatprep.subr.bf16.mxu1 %v1731_v29  ;;  %1341 = vmatmul.mubr.f32.vlgmr.msra.gmra.mrb[0].mxu1 %v975_v58  ;;  %v1741_v58 = vpack.c.bf16 %v2693_v9, %v1040_v18 }
 0x329   :  { %1734 = vmatpush1.bf16.msra.mxu1 %v1733_v16  ;;  %1465 = vmatprep.mubr.f32.mxu1 %v2665_v33 }
 0x32a   :  { %1736 = vmatprep.subr.bf16.mxu1 %v1735_v4 }
 0x32d   :  { %1738 = vmatpush1.bf16.msra.mxu1 %v1737_v40 }
 0x32e   :  { %1740 = vmatprep.subr.bf16.mxu1 %v1739_v19 }
 0x331   :  { %1742 = vmatpush1.bf16.msra.mxu1 %v1741_v58 }
 0x332   :  { %1744 = vmatprep.subr.bf16.mxu1 %v1743_v41 }
 0x335   :  { %1746 = vmatpush1.bf16.msra.mxu1 %v1745_v59 }
 0x336   :  { %1414 = vmatprep.subr.mxu1 %v1082_v10 }
 0x339   :  { %1418 = vmatpush1.msra.mxu1 %v1088_v48 }
 0x33a   :  { %1748 = vmatprep.subr.bf16.mxu1 %v2338_v31  ;;  %1467 = vmatmul.mubr.f32.vlgmr.msra.gmra.mrb[0].mxu1 %v2342_v38  ;;  %v885_v31 = vpop.permute.xlu0 %884 }
 0x33b   :  { %1750 = vmatpush1.bf16.msra.mxu1 %v2340_v46  ;;  %1555 = vmatprep.mubr.f32.mxu1 %v2665_v33 }
 0x33c   :  { %1752 = vmatprep.subr.bf16.mxu1 %v2371_v54 }
 0x33f   :  { %1754 = vmatpush1.bf16.msra.mxu1 %v2373_v7  ;;  %v1804_v7 = vld [vmem:[%s2620_s0] sm:$0xff] }
 0x340   :  { %1756 = vmatprep.subr.bf16.mxu1 %v2391_v5  ;;  %v1805_v5 = vld [vmem:[%s2620_s0 + $0x8] sm:$0xff] }
 0x343   :  { %1758 = vmatpush1.bf16.msra.mxu1 %v2393_v11 }
 0x344   :  { %1760 = vmatprep.subr.bf16.mxu1 %v2445_v49 }
 0x347   :  { %1762 = vmatpush1.bf16.msra.mxu1 %v2447_v57 }
 0x348   :  { %1506 = vmatprep.subr.mxu1 %v2455_v2 }
 0x34b   :  { %1508 = vmatpush1.msra.mxu1 %v2481_v63 }
 0x34c   :  { %1557 = vmatmul.mubr.f32.vlgmr.msra.gmra.mrb[0].mxu1 %v2342_v38 }
 0x41f   :  { %v1558_v33 = vpop.f32.mrb[0].mxu1 }
 0x420   :  { %v1765_v46 = vadd.f32 %v1558_v33, %v885_v31  ;;  %v1560_v36 = vpop.f32.mrb[1].mxu1 }
 0x421   :  { %v1766_v54 = vadd.f32 %v1560_v36, %v885_v31 }
 0x422   :  { %v1563_v18 = vadd.f32 %v1804_v7, %v1765_v46 }
 0x423   :  { %v1564_v11 = vadd.f32 %v1805_v5, %v1766_v54 }
 0x424   :  { %1565 = vst [vmem:[%s2624_s5] sm:$0xff] %v1563_v18 }
 0x425   :  { %1566 = vst [vmem:[%s2624_s5 + $0x8] sm:$0xff] %v1564_v11 }

</bundles_post_ra>
